<compile_context>
chip_gen: v5e
topology: v5e:2x2
jax: 0.10.0
libtpu: 0.0.40
codegen_flags: <defaults>
</compile_context>

<pallas_src>
import jax
import jax.numpy as jnp
from jax.experimental import pallas as pl
from jax.experimental.pallas import tpu as pltpu

B = 1          # batch (x1 = torch.randn(1, 5))
K = 5          # input_channels
N = 1024       # out_features of nn.Linear
LANE = 128
SUB = N // LANE  # 8 -> output tile is (8, 128), exactly one f32 vreg per row


def linear_sub_relu_kernel(x_ref, w_ref, o_ref):
    # x_ref: SMEM (K,) f32          -- activations as scalars
    # w_ref: VMEM (K+1, SUB, LANE)  -- rows 0..K-1 weight, row K = bias
    # o_ref: VMEM (SUB, LANE)       -- relu(x @ W + b - 0.05), sublane-dense
    acc = w_ref[K] - 0.05                      # bias row, constant folded in-kernel
    # K = 5: static unroll of scalar-splat FMAs on the VPU (no MXU, no XLU).
    for k in range(K):
        acc = acc + x_ref[k] * w_ref[k]        # scalar * (8,128) vreg tiles
    # Single lane-dense, unmasked (8,128) store.
    o_ref[...] = jnp.maximum(acc, 0.0).astype(o_ref.dtype)


def make_params(w_torch, b):
    """One-time (init-time) packing of nn.Linear params.

    w_torch: (N, K) as stored by torch.nn.Linear, b: (N,).
    Returns w_aug: (K+1, SUB, LANE) with the bias as the last row.
    """
    w = w_torch.T.reshape(K, SUB, LANE)        # (K, 8, 128), row-major identical to (K, N)
    b3 = b.reshape(1, SUB, LANE)               # (1, 8, 128)
    return jnp.concatenate([w, b3], axis=0)    # (K+1, 8, 128)


def model_forward(x, w_aug):
    # x: (B, K) f32, w_aug: (K+1, SUB, LANE) f32
    x_s = x.reshape(K)                         # flat scalars for SMEM
    out8 = pl.pallas_call(
        linear_sub_relu_kernel,
        out_shape=jax.ShapeDtypeStruct((SUB, LANE), jnp.float32),
        # Grid-free: one invocation, everything resident (w_aug ~24 KiB, out 4 KiB).
        in_specs=[
            pl.BlockSpec(memory_space=pltpu.MemorySpace.SMEM),       # x scalars
            pl.BlockSpec((K + 1, SUB, LANE), lambda: (0, 0, 0)),     # weight + bias
        ],
        out_specs=pl.BlockSpec((SUB, LANE), lambda: (0, 0)),
    )(x_s, w_aug)
    return out8.reshape(B, N)                  # free re-layout back to (1, 1024)


def reference(x, w_torch, b):
    return jnp.maximum(x @ w_torch.T + b - 0.05, 0.0)


if __name__ == "__main__":
    key = jax.random.PRNGKey(0)
    kx, kw, kb = jax.random.split(key, 3)

    # Deterministic synthetic Linear params (torch layout: W (N, K), b (N,)).
    bound = 1.0 / (K ** 0.5)
    w_torch = jax.random.uniform(kw, (N, K), jnp.float32, -bound, bound)
    b = jax.random.uniform(kb, (N,), jnp.float32, -bound, bound)
    w_aug = make_params(w_torch, b)            # done once, outside the hot path

    x = jax.random.normal(kx, (B, K), jnp.float32)

    out = model_forward(x, w_aug)
    out = jax.block_until_ready(out)

    ref = reference(x, w_torch, b)
    assert out.shape == (B, N), out.shape
    assert jnp.allclose(out, ref, atol=1e-5, rtol=1e-5), "mismatch vs reference"

    print("KERNEL_OK")
</pallas_src>

<mosaic_0001>
module attributes {stable_mosaic.version = 11 : i64} {
  func.func @linear_sub_relu_kernel(%arg0: memref<5xf32, #tpu.memory_space<smem>>, %arg1: memref<6x8x128xf32, #tpu.memory_space<vmem>>, %arg2: memref<8x128xf32, #tpu.memory_space<vmem>>) attributes {dimension_semantics = [], scalar_prefetch = 0 : i64, scratch_operands = 0 : i64, tpu.core_type = #tpu.core_type<tc>} {
    %c5 = arith.constant 5 : index
    %c0 = arith.constant 0 : index
    %c0_0 = arith.constant 0 : index
    %0 = vector.load %arg1[%c5, %c0, %c0_0] : memref<6x8x128xf32, #tpu.memory_space<vmem>>, vector<1x8x128xf32>
    %1 = vector.shape_cast %0 : vector<1x8x128xf32> to vector<8x128xf32>
    %cst = arith.constant 5.000000e-02 : f32
    %2 = vector.broadcast %cst : f32 to vector<8x128xf32>
    %3 = arith.subf %1, %2 : vector<8x128xf32>
    %c0_1 = arith.constant 0 : index
    %4 = memref.load %arg0[%c0_1] : memref<5xf32, #tpu.memory_space<smem>>
    %c0_2 = arith.constant 0 : index
    %c0_3 = arith.constant 0 : index
    %c0_4 = arith.constant 0 : index
    %5 = vector.load %arg1[%c0_2, %c0_3, %c0_4] : memref<6x8x128xf32, #tpu.memory_space<vmem>>, vector<1x8x128xf32>
    %6 = vector.shape_cast %5 : vector<1x8x128xf32> to vector<8x128xf32>
    %7 = vector.broadcast %4 : f32 to vector<8x128xf32>
    %8 = arith.mulf %7, %6 : vector<8x128xf32>
    %9 = arith.addf %3, %8 : vector<8x128xf32>
    %c1 = arith.constant 1 : index
    %10 = memref.load %arg0[%c1] : memref<5xf32, #tpu.memory_space<smem>>
    %c1_5 = arith.constant 1 : index
    %c0_6 = arith.constant 0 : index
    %c0_7 = arith.constant 0 : index
    %11 = vector.load %arg1[%c1_5, %c0_6, %c0_7] : memref<6x8x128xf32, #tpu.memory_space<vmem>>, vector<1x8x128xf32>
    %12 = vector.shape_cast %11 : vector<1x8x128xf32> to vector<8x128xf32>
    %13 = vector.broadcast %10 : f32 to vector<8x128xf32>
    %14 = arith.mulf %13, %12 : vector<8x128xf32>
    %15 = arith.addf %9, %14 : vector<8x128xf32>
    %c2 = arith.constant 2 : index
    %16 = memref.load %arg0[%c2] : memref<5xf32, #tpu.memory_space<smem>>
    %c2_8 = arith.constant 2 : index
    %c0_9 = arith.constant 0 : index
    %c0_10 = arith.constant 0 : index
    %17 = vector.load %arg1[%c2_8, %c0_9, %c0_10] : memref<6x8x128xf32, #tpu.memory_space<vmem>>, vector<1x8x128xf32>
    %18 = vector.shape_cast %17 : vector<1x8x128xf32> to vector<8x128xf32>
    %19 = vector.broadcast %16 : f32 to vector<8x128xf32>
    %20 = arith.mulf %19, %18 : vector<8x128xf32>
    %21 = arith.addf %15, %20 : vector<8x128xf32>
    %c3 = arith.constant 3 : index
    %22 = memref.load %arg0[%c3] : memref<5xf32, #tpu.memory_space<smem>>
    %c3_11 = arith.constant 3 : index
    %c0_12 = arith.constant 0 : index
    %c0_13 = arith.constant 0 : index
    %23 = vector.load %arg1[%c3_11, %c0_12, %c0_13] : memref<6x8x128xf32, #tpu.memory_space<vmem>>, vector<1x8x128xf32>
    %24 = vector.shape_cast %23 : vector<1x8x128xf32> to vector<8x128xf32>
    %25 = vector.broadcast %22 : f32 to vector<8x128xf32>
    %26 = arith.mulf %25, %24 : vector<8x128xf32>
    %27 = arith.addf %21, %26 : vector<8x128xf32>
    %c4 = arith.constant 4 : index
    %28 = memref.load %arg0[%c4] : memref<5xf32, #tpu.memory_space<smem>>
    %c4_14 = arith.constant 4 : index
    %c0_15 = arith.constant 0 : index
    %c0_16 = arith.constant 0 : index
    %29 = vector.load %arg1[%c4_14, %c0_15, %c0_16] : memref<6x8x128xf32, #tpu.memory_space<vmem>>, vector<1x8x128xf32>
    %30 = vector.shape_cast %29 : vector<1x8x128xf32> to vector<8x128xf32>
    %31 = vector.broadcast %28 : f32 to vector<8x128xf32>
    %32 = arith.mulf %31, %30 : vector<8x128xf32>
    %33 = arith.addf %27, %32 : vector<8x128xf32>
    %cst_17 = arith.constant 0.000000e+00 : f32
    %34 = vector.broadcast %cst_17 : f32 to vector<8x128xf32>
    %35 = arith.maximumf %33, %34 : vector<8x128xf32>
    %c0_18 = arith.constant 0 : index
    %c0_19 = arith.constant 0 : index
    %36 = vector.load %arg2[%c0_18, %c0_19] : memref<8x128xf32, #tpu.memory_space<vmem>>, vector<8x128xf32>
    tpu.vector_store %arg2[%c0_18, %c0_19], %35 {strides = array<i32>} : memref<8x128xf32, #tpu.memory_space<vmem>>, vector<8x128xf32>,
    return
  }
}

</mosaic_0001>

<bundles_post_ra>
// kernel: tpu_custom_call.1
= control target key start
LH: loop header
LB: loop body
LE: loop exit
PB: predicated region body
PF: predicated region fallthrough
CT: control target
= control target key end

     0   :  { %7 = vsyncpa [#allocation5], 0  ;;  %s198_s0 = inlined_call_operand.hbm [shape: f32[5], index: 0, kind: input, shape index: {}]   ;;  %s199_s1 = inlined_call_operand.hbm [shape: f32[6,8,128], index: 1, kind: input, shape index: {}]   ;;  %s200_s2 = inlined_call_operand.hbm [shape: f32[8,128], index: 2, kind: output, shape index: {}]  }
   0x1   :  { %8 = vsyncpa [#allocation3], 0 }
   0x2   :  { %9 = vsyncpa [#allocation4], 0  ;;  %s15_s11 = sshll.u32 %s198_s0, 4  ;;  %s23_s14 = sshll.u32 %s199_s1, 4  ;;  %s16_s11 = int_to_ptr.hbm [resolvable:$true] %s15_s11  ;;  %s24_s14 = int_to_ptr.hbm [resolvable:$true] %s23_s14 }
   0x3   :  { %s169_s15 = smov [#allocation2]   ;;  %s170_s16 = smov [#allocation6]  }
   0x4   :  { %18 = dma.hbm_to_smem %s16_s11, 16, %s169_s15, [#allocation5]  }
   0x5   :  { %s25_s17 = sshll.u32 %s170_s16, 4  ;;  %s171_s18 = smov 128   ;;  %s26_s17 = int_to_ptr.vmem [resolvable:$true] %s25_s17 }
   0x6   :  { %s172_s19 = smov 8  }
   0x7   :  { %31 = dma.hbm_to_vmem [thread:$0]  %s24_s14, 768, %s26_s17, [#allocation3], %s171_s18, %s171_s18, %s172_s19  }
   0x8   :  { %163 = dma.done.wait [#allocation5], 16  }
   0x9   :  { %164 = vsyncadd [#allocation5], 4294967280 }
   0xa   :  { %165 = dma.done.wait [#allocation3], 768  }
   0xb   :  { %166 = vsyncadd [#allocation3], 4294966528 }
   0xc   :  { %40 = sfence }
   0xd   :  { %s44_s0 = sld [smem:[#allocation2]]  ;;  %v42_v0 = vld [vmem:[#allocation6 + $0x28] sm:$0xff]  ;;  %v45_v1 = vld [vmem:[#allocation6] sm:$0xff]  ;;  %v57_v5 = vld [vmem:[#allocation6 + $0x10] sm:$0xff]  ;;  %s173_s23 = smov [#allocation7]  }
   0xe   :  { %s94_s20 = sld [smem:[#allocation2 + $0x1]]  ;;  %v93_v2 = vadd.f32 -0.05, %v42_v0  ;;  %v51_v3 = vld [vmem:[#allocation6 + $0x8] sm:$0xff]  ;;  %v63_v10 = vld [vmem:[#allocation6 + $0x18] sm:$0xff]  ;;  %v69_v14 = vld [vmem:[#allocation6 + $0x20] sm:$0xff] }
   0xf   :  { %s95_s21 = sld [smem:[#allocation2 + $0x2]]  ;;  %s80_s24 = sshll.u32 %s173_s23, 4  ;;  %s81_s24 = int_to_ptr.vmem [resolvable:$true] %s80_s24 }
  0x10   :  { %s96_s22 = sld [smem:[#allocation2 + $0x3]]  ;;  %s82_s27 = sshll.u32 %s200_s2, 4  ;;  %s83_s27 = int_to_ptr.hbm [resolvable:$true] %s82_s27 }
  0x11   :  { %s97_s1 = sld [smem:[#allocation2 + $0x4]] }
  0x13   :  { %v46_v4 = vstv %s44_s0 }
  0x14   :  { %v47_v6 = vmul.f32 %v46_v4, %v45_v1  ;;  %v52_v7 = vstv %s94_s20 }
  0x15   :  { %v53_v8 = vmul.f32 %v52_v7, %v51_v3  ;;  %v58_v9 = vstv %s95_s21 }
  0x16   :  { %v48_v11 = vadd.f32 %v93_v2, %v47_v6  ;;  %v59_v12 = vmul.f32 %v58_v9, %v57_v5  ;;  %v64_v13 = vstv %s96_s22 }
  0x17   :  { %v70_v15 = vstv %s97_s1  ;;  %v65_v17 = vmul.f32 %v64_v13, %v63_v10 }
  0x18   :  { %v54_v16 = vadd.f32 %v53_v8, %v48_v11  ;;  %v71_v19 = vmul.f32 %v70_v15, %v69_v14 }
  0x1a   :  { %v60_v18 = vadd.f32 %v59_v12, %v54_v16 }
  0x1c   :  { %v66_v20 = vadd.f32 %v65_v17, %v60_v18 }
  0x1e   :  { %v72_v21 = vadd.f32 %v71_v19, %v66_v20 }
  0x20   :  { %v73_v22 = vmax.f32 %v72_v21, 0.0 }
  0x22   :  { %74 = vst [vmem:[#allocation7] sm:$0xff] %v73_v22 }
  0x23   :  { %85 = dma.vmem_to_hbm [thread:$0]  %s81_s24, 128, %s83_s27, [#allocation4]  }
  0x24   :  { %167 = dma.done.wait [#allocation4], 128  }
  0x25   :  { %168 = vsyncadd [#allocation4], 4294967168 }
  0x26   :  { %90 = vsyncpa [#allocation3], 1 }
  0x27   :  { %91 = vsyncpa [#allocation4], 1 }
  0x28   :  { %92 = vsyncpa [#allocation5], 1 }

</bundles_post_ra>
